<compile_context>
chip_gen: v5e
topology: v5e:2x2
jax: 0.10.0
libtpu: 0.0.40
codegen_flags: <defaults>
</compile_context>

<pallas_src>
import math

import jax
import jax.numpy as jnp
from jax import lax
from jax.experimental import pallas as pl
from jax.experimental.pallas import tpu as pltpu

IN_DIM = 32
OUT_DIM = 32
N_HEADS = 4
D_K = OUT_DIM // N_HEADS
SQRT_DK = math.sqrt(D_K)

NODE_DICT = {"a": 0, "b": 1}
EDGE_DICT = {"r0": 0, "r1": 1, "r2": 2}
CANONICAL_ETYPES = [("a", "r0", "b"), ("b", "r1", "a"), ("a", "r2", "b")]
NUM_NODES = {"a": 16, "b": 16}

_VMEM = pltpu.MemorySpace.VMEM


def _vmem_specs(n):
    return [pl.BlockSpec(memory_space=_VMEM) for _ in range(n)]


# ------------------------- fused Pallas kernel ------------------------------

def _hgt_fused_kernel(
    h_a_ref, h_b_ref,                # (N, IN_DIM) f32
    wq_ref, bq_ref,                  # (T, IN_DIM, OUT_DIM) bf16, (T, 1, OUT_DIM) f32
    wk_ref, bk_ref,                  # (R, IN_DIM, OUT_DIM) bf16, (R, 1, OUT_DIM) f32
    wv_ref, bv_ref,                  # (R, IN_DIM, OUT_DIM) bf16, (R, 1, OUT_DIM) f32
    hmask_ref,                       # (N_HEADS*N, OUT_DIM) f32 head-block mask
    m0_ref, m1_ref, m2_ref,          # (N_dst, N_HEADS*N_src) int8, head-tiled edge masks
    wa_ref, ba_ref, oma_ref,         # (T, OUT, OUT) bf16, (T,1,OUT) f32, (T,1) f32
    out_a_ref, out_b_ref,            # (N, OUT_DIM) f32
):
    h_refs = {"a": h_a_ref, "b": h_b_ref}
    out_refs = {"a": out_a_ref, "b": out_b_ref}
    mask_refs = [m0_ref, m1_ref, m2_ref]

    hmask = hmask_ref[...]                       # (4N, 32) f32, 0/1 per head block
    hmask_bf = hmask.astype(jnp.bfloat16)

    # --- stage 1: q projection per node type (bf16 MXU, f32 accumulation) ----
    h_f32, h_bf, q = {}, {}, {}
    for nt, tid in NODE_DICT.items():
        hf = h_refs[nt][...]
        hb = hf.astype(jnp.bfloat16)
        h_f32[nt], h_bf[nt] = hf, hb
        q[nt] = jnp.dot(hb, wq_ref[tid],
                        preferred_element_type=jnp.float32) + bq_ref[tid]

    # --- stage 2: per-etype attention, all heads in one shot ------------------
    agg = {nt: None for nt in NODE_DICT}         # register accumulators (no scratch)
    for e_idx, (srctype, etype, dsttype) in enumerate(CANONICAL_ETYPES):
        e_id = EDGE_DICT[etype]
        # relation_att (pre-scaled by pri/sqrt_dk) / relation_msg are folded
        # into wk/wv, so k_rel / v_rel come straight from h_src.
        k_rel = jnp.dot(h_bf[srctype], wk_ref[e_id],
                        preferred_element_type=jnp.float32) + bk_ref[e_id]   # (N_src, 32)
        v_rel = jnp.dot(h_bf[srctype], wv_ref[e_id],
                        preferred_element_type=jnp.float32) + bv_ref[e_id]   # (N_src, 32)
        # replicate along sublanes (cheap vreg stacking) + mask to head blocks
        k_big = jnp.concatenate([k_rel] * N_HEADS, axis=0) * hmask           # (4N_src, 32)
        v_big = (jnp.concatenate([v_rel] * N_HEADS, axis=0) * hmask
                 ).astype(jnp.bfloat16)                                      # (4N_src, 32)

        # scores for all heads at once: (N_dst, 4*N_src); f32 so exp() stays accurate
        s = lax.dot_general(q[dsttype], k_big, (((1,), (1,)), ((), ())),
                            preferred_element_type=jnp.float32)
        mask_f = mask_refs[e_idx][...].astype(jnp.float32)                   # 0/1
        s = s * mask_f - (1.0 - mask_f) * jnp.float32(1e30)
        m = jnp.max(s, axis=-1, keepdims=True)      # one max per etype, not per head
        p = jnp.exp(s - m) * mask_f                 # multiplicative zero keeps fully-masked rows at 0
        p_bf = p.astype(jnp.bfloat16)

        # unnormalized per-head aggregation + per-head denominators (the head
        # mask doubles as the lane-broadcast matrix for the denominators).
        agg_un = jnp.dot(p_bf, v_big, preferred_element_type=jnp.float32)    # (N_dst, 32)
        den = jnp.dot(p_bf, hmask_bf, preferred_element_type=jnp.float32)    # (N_dst, 32)
        den = jnp.maximum(den, jnp.float32(1e-30))
        t_e = agg_un * pl.reciprocal(den, approx=True)
        agg[dsttype] = t_e if agg[dsttype] is None else agg[dsttype] + t_e

    # --- stage 3: a_linear + gated skip (alpha and 1/n_etypes pre-folded) ----
    for nt, tid in NODE_DICT.items():
        t = agg[nt]
        if t is None:
            t = jnp.zeros((h_f32[nt].shape[0], OUT_DIM), jnp.float32)
        trans = jnp.dot(t.astype(jnp.bfloat16), wa_ref[tid],
                        preferred_element_type=jnp.float32) + ba_ref[tid]
        oma = oma_ref[tid:tid + 1, 0:1]             # (1,1) = 1 - sigmoid(skip[t])
        out_refs[nt][...] = trans + h_f32[nt] * oma


# ------------------------- wrapper / preprocessing ---------------------------

def prepare_params(params):
    """One-time weight preprocessing (outside the traced forward)."""
    T, R = len(NODE_DICT), len(EDGE_DICT)

    def block_diag(rel):  # (H, d_k, d_k) -> (OUT_DIM, OUT_DIM)
        bd = jnp.zeros((OUT_DIM, OUT_DIM), jnp.float32)
        for hh in range(N_HEADS):
            sl = slice(hh * D_K, (hh + 1) * D_K)
            bd = bd.at[sl, sl].set(rel[hh])
        return bd

    # relation_pri / sqrt(d_k) folded into the att block-diagonal
    att_bd = [block_diag(params["relation_att"][e]
                         * (params["relation_pri"][e][:, None, None] / SQRT_DK))
              for e in range(R)]
    msg_bd = [block_diag(params["relation_msg"][e]) for e in range(R)]

    src_of = {EDGE_DICT[e]: NODE_DICT[s] for (s, e, _) in CANONICAL_ETYPES}

    wk_rel, bk_rel, wv_rel, bv_rel = [], [], [], []
    for e in range(R):
        sid = src_of[e]
        wk_rel.append(params["k_w"][sid].T @ att_bd[e])                 # (IN, OUT)
        bk_rel.append((params["k_b"][sid] @ att_bd[e]).reshape(1, OUT_DIM))
        wv_rel.append(params["v_w"][sid].T @ msg_bd[e])
        bv_rel.append((params["v_b"][sid] @ msg_bd[e]).reshape(1, OUT_DIM))
    wk_rel = jnp.stack(wk_rel).astype(jnp.bfloat16)
    wv_rel = jnp.stack(wv_rel).astype(jnp.bfloat16)
    bk_rel = jnp.stack(bk_rel)
    bv_rel = jnp.stack(bv_rel)

    wq_t = jnp.transpose(params["q_w"], (0, 2, 1)).astype(jnp.bfloat16)  # (T, IN, OUT)
    bq = params["q_b"].reshape(T, 1, OUT_DIM)

    # static head-block mask: rows h*N..(h+1)*N-1, cols h*d_k..(h+1)*d_k-1 == 1
    n_nodes = NUM_NODES["a"]
    assert all(n == n_nodes for n in NUM_NODES.values())
    row_head = jnp.repeat(jnp.arange(N_HEADS), n_nodes)
    col_head = jnp.repeat(jnp.arange(N_HEADS), D_K)
    hmask = (row_head[:, None] == col_head[None, :]).astype(jnp.float32)  # (4N, OUT)

    # fold sigmoid(skip) and the cross-etype mean into a_linear
    alpha = jax.nn.sigmoid(params["skip"])                                # (T,)
    n_in = {nt: 0 for nt in NODE_DICT}
    for (_, _, d) in CANONICAL_ETYPES:
        n_in[d] += 1
    n_in_by_tid = [1] * T
    for nt, tid in NODE_DICT.items():
        n_in_by_tid[tid] = max(n_in[nt], 1)
    scale = alpha / jnp.array(n_in_by_tid, jnp.float32)                   # (T,)
    wa_alpha = (jnp.transpose(params["a_w"], (0, 2, 1))
                * scale[:, None, None]).astype(jnp.bfloat16)              # (T, OUT, OUT)
    ba_alpha = (params["a_b"] * alpha[:, None]).reshape(T, 1, OUT_DIM)
    oma = (1.0 - alpha).reshape(T, 1)

    return dict(wq_t=wq_t, bq=bq, wk_rel=wk_rel, bk_rel=bk_rel,
                wv_rel=wv_rel, bv_rel=bv_rel, hmask=hmask,
                wa_alpha=wa_alpha, ba_alpha=ba_alpha, oma=oma)


def prepare_graph(masks):
    """One-time graph preprocessing: int8, head-tiled adjacency masks."""
    out = []
    for ce in CANONICAL_ETYPES:
        m = (masks[ce] > 0.5).astype(jnp.int8)        # (N_dst, N_src)
        out.append(jnp.tile(m, (1, N_HEADS)))          # (N_dst, N_HEADS*N_src)
    return out


def hgt_layer_forward(prep, graph_masks, h):
    n_a, n_b = NUM_NODES["a"], NUM_NODES["b"]
    out_a, out_b = pl.pallas_call(
        _hgt_fused_kernel,
        out_shape=(jax.ShapeDtypeStruct((n_a, OUT_DIM), jnp.float32),
                   jax.ShapeDtypeStruct((n_b, OUT_DIM), jnp.float32)),
        in_specs=_vmem_specs(15),
        out_specs=(pl.BlockSpec(memory_space=_VMEM),
                   pl.BlockSpec(memory_space=_VMEM)),
    )(h["a"], h["b"],
      prep["wq_t"], prep["bq"],
      prep["wk_rel"], prep["bk_rel"],
      prep["wv_rel"], prep["bv_rel"],
      prep["hmask"],
      graph_masks[0], graph_masks[1], graph_masks[2],
      prep["wa_alpha"], prep["ba_alpha"], prep["oma"])
    return {"a": out_a, "b": out_b}


# ----------------------- pure-JAX reference (check) --------------------------

def ref_forward(params, h, masks):
    def lin(x, w, b):
        return x @ w.T + b

    per_dst = {nt: [] for nt in NODE_DICT}
    for (srctype, etype, dsttype) in CANONICAL_ETYPES:
        e_id = EDGE_DICT[etype]
        sid, did = NODE_DICT[srctype], NODE_DICT[dsttype]
        k = lin(h[srctype], params["k_w"][sid], params["k_b"][sid]).reshape(-1, N_HEADS, D_K)
        v = lin(h[srctype], params["v_w"][sid], params["v_b"][sid]).reshape(-1, N_HEADS, D_K)
        q = lin(h[dsttype], params["q_w"][did], params["q_b"][did]).reshape(-1, N_HEADS, D_K)
        k = jnp.einsum("bij,ijk->bik", k, params["relation_att"][e_id])
        v = jnp.einsum("bij,ijk->bik", v, params["relation_msg"][e_id])
        mask = masks[(srctype, etype, dsttype)] > 0.5
        s = jnp.einsum("dhi,shi->dsh", q, k) * params["relation_pri"][e_id] / SQRT_DK
        s = jnp.where(mask[:, :, None], s, -1e30)
        m = jnp.max(s, axis=1, keepdims=True)
        p = jnp.where(mask[:, :, None], jnp.exp(s - m), 0.0)
        denom = jnp.sum(p, axis=1, keepdims=True)
        attn = p / jnp.maximum(denom, 1e-30)
        agg = jnp.einsum("dsh,shi->dhi", attn, v).reshape(-1, OUT_DIM)
        per_dst[dsttype].append(agg)

    new_h = {}
    for nt, tid in NODE_DICT.items():
        t = sum(per_dst[nt]) / float(len(per_dst[nt]))
        alpha = jax.nn.sigmoid(params["skip"][tid])
        trans = lin(t, params["a_w"][tid], params["a_b"][tid])
        new_h[nt] = trans * alpha + h[nt] * (1.0 - alpha)
    return new_h


# ----------------------------- init / main -----------------------------------

def init_params(key):
    T, R = len(NODE_DICT), len(EDGE_DICT)
    keys = jax.random.split(key, 10)

    def lin_init(k, shape, fan_in):
        bound = 1.0 / math.sqrt(fan_in)
        return jax.random.uniform(k, shape, jnp.float32, -bound, bound)

    xav = math.sqrt(6.0 / (D_K + D_K))
    params = {
        "k_w": lin_init(keys[0], (T, OUT_DIM, IN_DIM), IN_DIM),
        "k_b": lin_init(keys[1], (T, OUT_DIM), IN_DIM),
        "q_w": lin_init(keys[2], (T, OUT_DIM, IN_DIM), IN_DIM),
        "q_b": lin_init(keys[3], (T, OUT_DIM), IN_DIM),
        "v_w": lin_init(keys[4], (T, OUT_DIM, IN_DIM), IN_DIM),
        "v_b": lin_init(keys[5], (T, OUT_DIM), IN_DIM),
        "a_w": lin_init(keys[6], (T, OUT_DIM, OUT_DIM), OUT_DIM),
        "a_b": lin_init(keys[7], (T, OUT_DIM), OUT_DIM),
        "relation_att": jax.random.uniform(keys[8], (R, N_HEADS, D_K, D_K),
                                           jnp.float32, -xav, xav),
        "relation_msg": jax.random.uniform(keys[9], (R, N_HEADS, D_K, D_K),
                                           jnp.float32, -xav, xav),
        "relation_pri": jnp.ones((R, N_HEADS), jnp.float32),
        "skip": jnp.ones((T,), jnp.float32),
    }
    return params


def make_masks(key):
    masks = {}
    ks = jax.random.split(key, len(CANONICAL_ETYPES))
    for kk, (s, e, d) in zip(ks, CANONICAL_ETYPES):
        m = jax.random.bernoulli(kk, 0.5, (NUM_NODES[d], NUM_NODES[s]))
        masks[(s, e, d)] = m.astype(jnp.float32)
    return masks


if __name__ == "__main__":
    key = jax.random.PRNGKey(0)
    kp, kh, kg = jax.random.split(key, 3)
    params = init_params(kp)
    hkeys = jax.random.split(kh, len(NODE_DICT))
    h = {nt: jax.random.normal(hkeys[i], (NUM_NODES[nt], IN_DIM), jnp.float32)
         for i, nt in enumerate(NODE_DICT)}
    masks = make_masks(kg)

    prep = prepare_params(params)
    graph = prepare_graph(masks)
    out = hgt_layer_forward(prep, graph, h)
    out = jax.tree_util.tree_map(jax.block_until_ready, out)

    ref = ref_forward(params, h, masks)
    for nt in NODE_DICT:
        assert out[nt].shape == (NUM_NODES[nt], OUT_DIM)
        assert bool(jnp.isfinite(out[nt]).all())
        diff = jnp.abs(out[nt] - ref[nt])
        max_err = float(jnp.max(diff))
        mean_err = float(jnp.mean(diff))
        # bf16 MXU operands (f32 accumulation) + approximate EUP reciprocal in
        # the softmax normalization => tolerance is looser than pure-f32, but
        # still far below any real-bug signature (O(0.3+) errors).
        assert max_err < 1e-1 and mean_err < 2e-2, (
            f"mismatch for node type {nt}: max {max_err}, mean {mean_err}")

    print("KERNEL_OK")
</pallas_src>

<mosaic_0001>
module attributes {stable_mosaic.version = 11 : i64} {
  func.func @_hgt_fused_kernel(%arg0: memref<16x32xf32, #tpu.memory_space<vmem>>, %arg1: memref<16x32xf32, #tpu.memory_space<vmem>>, %arg2: memref<2x32x32xbf16, #tpu.memory_space<vmem>>, %arg3: memref<2x1x32xf32, #tpu.memory_space<vmem>>, %arg4: memref<3x32x32xbf16, #tpu.memory_space<vmem>>, %arg5: memref<3x1x32xf32, #tpu.memory_space<vmem>>, %arg6: memref<3x32x32xbf16, #tpu.memory_space<vmem>>, %arg7: memref<3x1x32xf32, #tpu.memory_space<vmem>>, %arg8: memref<64x32xf32, #tpu.memory_space<vmem>>, %arg9: memref<16x64xi8, #tpu.memory_space<vmem>>, %arg10: memref<16x64xi8, #tpu.memory_space<vmem>>, %arg11: memref<16x64xi8, #tpu.memory_space<vmem>>, %arg12: memref<2x32x32xbf16, #tpu.memory_space<vmem>>, %arg13: memref<2x1x32xf32, #tpu.memory_space<vmem>>, %arg14: memref<2x1xf32, #tpu.memory_space<vmem>>, %arg15: memref<16x32xf32, #tpu.memory_space<vmem>>, %arg16: memref<16x32xf32, #tpu.memory_space<vmem>>) attributes {dimension_semantics = [], scalar_prefetch = 0 : i64, scratch_operands = 0 : i64, tpu.core_type = #tpu.core_type<tc>} {
    %c0 = arith.constant 0 : index
    %c0_0 = arith.constant 0 : index
    %0 = vector.load %arg8[%c0, %c0_0] : memref<64x32xf32, #tpu.memory_space<vmem>>, vector<64x32xf32>
    %1 = arith.truncf %0 : vector<64x32xf32> to vector<64x32xbf16>
    %c0_1 = arith.constant 0 : index
    %c0_2 = arith.constant 0 : index
    %2 = vector.load %arg0[%c0_1, %c0_2] : memref<16x32xf32, #tpu.memory_space<vmem>>, vector<16x32xf32>
    %3 = arith.truncf %2 : vector<16x32xf32> to vector<16x32xbf16>
    %c0_3 = arith.constant 0 : index
    %c0_4 = arith.constant 0 : index
    %c0_5 = arith.constant 0 : index
    %4 = vector.load %arg2[%c0_3, %c0_4, %c0_5] : memref<2x32x32xbf16, #tpu.memory_space<vmem>>, vector<1x32x32xbf16>
    %5 = vector.shape_cast %4 : vector<1x32x32xbf16> to vector<32x32xbf16>
    %cst = arith.constant dense<0.000000e+00> : vector<16x32xf32>
    %6 = tpu.matmul %3, %5, %cst {dimension_numbers = #tpu.dot_dimension_numbers<[1], [0], [0], [1], [0, 0, 1, 1], [], []>} : vector<16x32xbf16>, vector<32x32xbf16>, vector<16x32xf32> -> vector<16x32xf32>
    %c0_6 = arith.constant 0 : index
    %c0_7 = arith.constant 0 : index
    %c0_8 = arith.constant 0 : index
    %7 = vector.load %arg3[%c0_6, %c0_7, %c0_8] : memref<2x1x32xf32, #tpu.memory_space<vmem>>, vector<1x1x32xf32>
    %8 = vector.shape_cast %7 : vector<1x1x32xf32> to vector<1x32xf32>
    %9 = vector.broadcast %8 : vector<1x32xf32> to vector<16x32xf32>
    %10 = arith.addf %6, %9 : vector<16x32xf32>
    %c0_9 = arith.constant 0 : index
    %c0_10 = arith.constant 0 : index
    %11 = vector.load %arg1[%c0_9, %c0_10] : memref<16x32xf32, #tpu.memory_space<vmem>>, vector<16x32xf32>
    %12 = arith.truncf %11 : vector<16x32xf32> to vector<16x32xbf16>
    %c1 = arith.constant 1 : index
    %c0_11 = arith.constant 0 : index
    %c0_12 = arith.constant 0 : index
    %13 = vector.load %arg2[%c1, %c0_11, %c0_12] : memref<2x32x32xbf16, #tpu.memory_space<vmem>>, vector<1x32x32xbf16>
    %14 = vector.shape_cast %13 : vector<1x32x32xbf16> to vector<32x32xbf16>
    %cst_13 = arith.constant dense<0.000000e+00> : vector<16x32xf32>
    %15 = tpu.matmul %12, %14, %cst_13 {dimension_numbers = #tpu.dot_dimension_numbers<[1], [0], [0], [1], [0, 0, 1, 1], [], []>} : vector<16x32xbf16>, vector<32x32xbf16>, vector<16x32xf32> -> vector<16x32xf32>
    %c1_14 = arith.constant 1 : index
    %c0_15 = arith.constant 0 : index
    %c0_16 = arith.constant 0 : index
    %16 = vector.load %arg3[%c1_14, %c0_15, %c0_16] : memref<2x1x32xf32, #tpu.memory_space<vmem>>, vector<1x1x32xf32>
    %17 = vector.shape_cast %16 : vector<1x1x32xf32> to vector<1x32xf32>
    %18 = vector.broadcast %17 : vector<1x32xf32> to vector<16x32xf32>
    %19 = arith.addf %15, %18 : vector<16x32xf32>
    %c0_17 = arith.constant 0 : index
    %c0_18 = arith.constant 0 : index
    %c0_19 = arith.constant 0 : index
    %20 = vector.load %arg4[%c0_17, %c0_18, %c0_19] : memref<3x32x32xbf16, #tpu.memory_space<vmem>>, vector<1x32x32xbf16>
    %21 = vector.shape_cast %20 : vector<1x32x32xbf16> to vector<32x32xbf16>
    %cst_20 = arith.constant dense<0.000000e+00> : vector<16x32xf32>
    %22 = tpu.matmul %3, %21, %cst_20 {dimension_numbers = #tpu.dot_dimension_numbers<[1], [0], [0], [1], [0, 0, 1, 1], [], []>} : vector<16x32xbf16>, vector<32x32xbf16>, vector<16x32xf32> -> vector<16x32xf32>
    %c0_21 = arith.constant 0 : index
    %c0_22 = arith.constant 0 : index
    %c0_23 = arith.constant 0 : index
    %23 = vector.load %arg5[%c0_21, %c0_22, %c0_23] : memref<3x1x32xf32, #tpu.memory_space<vmem>>, vector<1x1x32xf32>
    %24 = vector.shape_cast %23 : vector<1x1x32xf32> to vector<1x32xf32>
    %25 = vector.broadcast %24 : vector<1x32xf32> to vector<16x32xf32>
    %26 = arith.addf %22, %25 : vector<16x32xf32>
    %c0_24 = arith.constant 0 : index
    %c0_25 = arith.constant 0 : index
    %c0_26 = arith.constant 0 : index
    %27 = vector.load %arg6[%c0_24, %c0_25, %c0_26] : memref<3x32x32xbf16, #tpu.memory_space<vmem>>, vector<1x32x32xbf16>
    %28 = vector.shape_cast %27 : vector<1x32x32xbf16> to vector<32x32xbf16>
    %cst_27 = arith.constant dense<0.000000e+00> : vector<16x32xf32>
    %29 = tpu.matmul %3, %28, %cst_27 {dimension_numbers = #tpu.dot_dimension_numbers<[1], [0], [0], [1], [0, 0, 1, 1], [], []>} : vector<16x32xbf16>, vector<32x32xbf16>, vector<16x32xf32> -> vector<16x32xf32>
    %c0_28 = arith.constant 0 : index
    %c0_29 = arith.constant 0 : index
    %c0_30 = arith.constant 0 : index
    %30 = vector.load %arg7[%c0_28, %c0_29, %c0_30] : memref<3x1x32xf32, #tpu.memory_space<vmem>>, vector<1x1x32xf32>
    %31 = vector.shape_cast %30 : vector<1x1x32xf32> to vector<1x32xf32>
    %32 = vector.broadcast %31 : vector<1x32xf32> to vector<16x32xf32>
    %33 = arith.addf %29, %32 : vector<16x32xf32>
    %34 = tpu.concatenate %26, %26, %26, %26 in 0 : vector<16x32xf32>, vector<16x32xf32>, vector<16x32xf32>, vector<16x32xf32> -> vector<64x32xf32>
    %35 = arith.mulf %34, %0 : vector<64x32xf32>
    %36 = tpu.concatenate %33, %33, %33, %33 in 0 : vector<16x32xf32>, vector<16x32xf32>, vector<16x32xf32>, vector<16x32xf32> -> vector<64x32xf32>
    %37 = arith.mulf %36, %0 : vector<64x32xf32>
    %38 = arith.truncf %37 : vector<64x32xf32> to vector<64x32xbf16>
    %cst_31 = arith.constant dense<0.000000e+00> : vector<16x64xf32>
    %39 = tpu.matmul %19, %35, %cst_31 {dimension_numbers = #tpu.dot_dimension_numbers<[1], [1], [0], [0], [0, 0, 1, 0], [], []>} : vector<16x32xf32>, vector<64x32xf32>, vector<16x64xf32> -> vector<16x64xf32>
    %c0_32 = arith.constant 0 : index
    %c0_33 = arith.constant 0 : index
    %40 = vector.load %arg9[%c0_32, %c0_33] : memref<16x64xi8, #tpu.memory_space<vmem>>, vector<16x64xi8>
    %41 = arith.sitofp %40 : vector<16x64xi8> to vector<16x64xf32>
    %42 = arith.mulf %39, %41 : vector<16x64xf32>
    %cst_34 = arith.constant 1.000000e+00 : f32
    %43 = vector.broadcast %cst_34 : f32 to vector<16x64xf32>
    %44 = arith.subf %43, %41 : vector<16x64xf32>
    %cst_35 = arith.constant 1.000000e+30 : f32
    %45 = vector.broadcast %cst_35 : f32 to vector<16x64xf32>
    %46 = arith.mulf %44, %45 : vector<16x64xf32>
    %47 = arith.subf %42, %46 : vector<16x64xf32>
    %cst_36 = arith.constant dense<0xFF800000> : vector<16xf32>
    %48 = vector.multi_reduction <maximumf>, %47, %cst_36 [1] : vector<16x64xf32> to vector<16xf32>
    %49 = vector.shape_cast %48 : vector<16xf32> to vector<16x1xf32>
    %50 = vector.broadcast %49 : vector<16x1xf32> to vector<16x64xf32>
    %51 = arith.subf %47, %50 : vector<16x64xf32>
    %52 = math.exp %51 : vector<16x64xf32>
    %53 = arith.mulf %52, %41 : vector<16x64xf32>
    %54 = arith.truncf %53 : vector<16x64xf32> to vector<16x64xbf16>
    %cst_37 = arith.constant dense<0.000000e+00> : vector<16x32xf32>
    %55 = tpu.matmul %54, %38, %cst_37 {dimension_numbers = #tpu.dot_dimension_numbers<[1], [0], [0], [1], [0, 0, 1, 1], [], []>} : vector<16x64xbf16>, vector<64x32xbf16>, vector<16x32xf32> -> vector<16x32xf32>
    %cst_38 = arith.constant dense<0.000000e+00> : vector<16x32xf32>
    %56 = tpu.matmul %54, %1, %cst_38 {dimension_numbers = #tpu.dot_dimension_numbers<[1], [0], [0], [1], [0, 0, 1, 1], [], []>} : vector<16x64xbf16>, vector<64x32xbf16>, vector<16x32xf32> -> vector<16x32xf32>
    %cst_39 = arith.constant 1.000000e-30 : f32
    %57 = vector.broadcast %cst_39 : f32 to vector<16x32xf32>
    %58 = arith.maximumf %56, %57 : vector<16x32xf32>
    %59 = tpu.reciprocal %58 {approx = true} : vector<16x32xf32> -> vector<16x32xf32>
    %60 = arith.mulf %55, %59 : vector<16x32xf32>
    %c1_40 = arith.constant 1 : index
    %c0_41 = arith.constant 0 : index
    %c0_42 = arith.constant 0 : index
    %61 = vector.load %arg4[%c1_40, %c0_41, %c0_42] : memref<3x32x32xbf16, #tpu.memory_space<vmem>>, vector<1x32x32xbf16>
    %62 = vector.shape_cast %61 : vector<1x32x32xbf16> to vector<32x32xbf16>
    %cst_43 = arith.constant dense<0.000000e+00> : vector<16x32xf32>
    %63 = tpu.matmul %12, %62, %cst_43 {dimension_numbers = #tpu.dot_dimension_numbers<[1], [0], [0], [1], [0, 0, 1, 1], [], []>} : vector<16x32xbf16>, vector<32x32xbf16>, vector<16x32xf32> -> vector<16x32xf32>
    %c1_44 = arith.constant 1 : index
    %c0_45 = arith.constant 0 : index
    %c0_46 = arith.constant 0 : index
    %64 = vector.load %arg5[%c1_44, %c0_45, %c0_46] : memref<3x1x32xf32, #tpu.memory_space<vmem>>, vector<1x1x32xf32>
    %65 = vector.shape_cast %64 : vector<1x1x32xf32> to vector<1x32xf32>
    %66 = vector.broadcast %65 : vector<1x32xf32> to vector<16x32xf32>
    %67 = arith.addf %63, %66 : vector<16x32xf32>
    %c1_47 = arith.constant 1 : index
    %c0_48 = arith.constant 0 : index
    %c0_49 = arith.constant 0 : index
    %68 = vector.load %arg6[%c1_47, %c0_48, %c0_49] : memref<3x32x32xbf16, #tpu.memory_space<vmem>>, vector<1x32x32xbf16>
    %69 = vector.shape_cast %68 : vector<1x32x32xbf16> to vector<32x32xbf16>
    %cst_50 = arith.constant dense<0.000000e+00> : vector<16x32xf32>
    %70 = tpu.matmul %12, %69, %cst_50 {dimension_numbers = #tpu.dot_dimension_numbers<[1], [0], [0], [1], [0, 0, 1, 1], [], []>} : vector<16x32xbf16>, vector<32x32xbf16>, vector<16x32xf32> -> vector<16x32xf32>
    %c1_51 = arith.constant 1 : index
    %c0_52 = arith.constant 0 : index
    %c0_53 = arith.constant 0 : index
    %71 = vector.load %arg7[%c1_51, %c0_52, %c0_53] : memref<3x1x32xf32, #tpu.memory_space<vmem>>, vector<1x1x32xf32>
    %72 = vector.shape_cast %71 : vector<1x1x32xf32> to vector<1x32xf32>
    %73 = vector.broadcast %72 : vector<1x32xf32> to vector<16x32xf32>
    %74 = arith.addf %70, %73 : vector<16x32xf32>
    %75 = tpu.concatenate %67, %67, %67, %67 in 0 : vector<16x32xf32>, vector<16x32xf32>, vector<16x32xf32>, vector<16x32xf32> -> vector<64x32xf32>
    %76 = arith.mulf %75, %0 : vector<64x32xf32>
    %77 = tpu.concatenate %74, %74, %74, %74 in 0 : vector<16x32xf32>, vector<16x32xf32>, vector<16x32xf32>, vector<16x32xf32> -> vector<64x32xf32>
    %78 = arith.mulf %77, %0 : vector<64x32xf32>
    %79 = arith.truncf %78 : vector<64x32xf32> to vector<64x32xbf16>
    %cst_54 = arith.constant dense<0.000000e+00> : vector<16x64xf32>
    %80 = tpu.matmul %10, %76, %cst_54 {dimension_numbers = #tpu.dot_dimension_numbers<[1], [1], [0], [0], [0, 0, 1, 0], [], []>} : vector<16x32xf32>, vector<64x32xf32>, vector<16x64xf32> -> vector<16x64xf32>
    %c0_55 = arith.constant 0 : index
    %c0_56 = arith.constant 0 : index
    %81 = vector.load %arg10[%c0_55, %c0_56] : memref<16x64xi8, #tpu.memory_space<vmem>>, vector<16x64xi8>
    %82 = arith.sitofp %81 : vector<16x64xi8> to vector<16x64xf32>
    %83 = arith.mulf %80, %82 : vector<16x64xf32>
    %cst_57 = arith.constant 1.000000e+00 : f32
    %84 = vector.broadcast %cst_57 : f32 to vector<16x64xf32>
    %85 = arith.subf %84, %82 : vector<16x64xf32>
    %cst_58 = arith.constant 1.000000e+30 : f32
    %86 = vector.broadcast %cst_58 : f32 to vector<16x64xf32>
    %87 = arith.mulf %85, %86 : vector<16x64xf32>
    %88 = arith.subf %83, %87 : vector<16x64xf32>
    %cst_59 = arith.constant dense<0xFF800000> : vector<16xf32>
    %89 = vector.multi_reduction <maximumf>, %88, %cst_59 [1] : vector<16x64xf32> to vector<16xf32>
    %90 = vector.shape_cast %89 : vector<16xf32> to vector<16x1xf32>
    %91 = vector.broadcast %90 : vector<16x1xf32> to vector<16x64xf32>
    %92 = arith.subf %88, %91 : vector<16x64xf32>
    %93 = math.exp %92 : vector<16x64xf32>
    %94 = arith.mulf %93, %82 : vector<16x64xf32>
    %95 = arith.truncf %94 : vector<16x64xf32> to vector<16x64xbf16>
    %cst_60 = arith.constant dense<0.000000e+00> : vector<16x32xf32>
    %96 = tpu.matmul %95, %79, %cst_60 {dimension_numbers = #tpu.dot_dimension_numbers<[1], [0], [0], [1], [0, 0, 1, 1], [], []>} : vector<16x64xbf16>, vector<64x32xbf16>, vector<16x32xf32> -> vector<16x32xf32>
    %cst_61 = arith.constant dense<0.000000e+00> : vector<16x32xf32>
    %97 = tpu.matmul %95, %1, %cst_61 {dimension_numbers = #tpu.dot_dimension_numbers<[1], [0], [0], [1], [0, 0, 1, 1], [], []>} : vector<16x64xbf16>, vector<64x32xbf16>, vector<16x32xf32> -> vector<16x32xf32>
    %cst_62 = arith.constant 1.000000e-30 : f32
    %98 = vector.broadcast %cst_62 : f32 to vector<16x32xf32>
    %99 = arith.maximumf %97, %98 : vector<16x32xf32>
    %100 = tpu.reciprocal %99 {approx = true} : vector<16x32xf32> -> vector<16x32xf32>
    %101 = arith.mulf %96, %100 : vector<16x32xf32>
    %c2 = arith.constant 2 : index
    %c0_63 = arith.constant 0 : index
    %c0_64 = arith.constant 0 : index
    %102 = vector.load %arg4[%c2, %c0_63, %c0_64] : memref<3x32x32xbf16, #tpu.memory_space<vmem>>, vector<1x32x32xbf16>
    %103 = vector.shape_cast %102 : vector<1x32x32xbf16> to vector<32x32xbf16>
    %cst_65 = arith.constant dense<0.000000e+00> : vector<16x32xf32>
    %104 = tpu.matmul %3, %103, %cst_65 {dimension_numbers = #tpu.dot_dimension_numbers<[1], [0], [0], [1], [0, 0, 1, 1], [], []>} : vector<16x32xbf16>, vector<32x32xbf16>, vector<16x32xf32> -> vector<16x32xf32>
    %c2_66 = arith.constant 2 : index
    %c0_67 = arith.constant 0 : index
    %c0_68 = arith.constant 0 : index
    %105 = vector.load %arg5[%c2_66, %c0_67, %c0_68] : memref<3x1x32xf32, #tpu.memory_space<vmem>>, vector<1x1x32xf32>
    %106 = vector.shape_cast %105 : vector<1x1x32xf32> to vector<1x32xf32>
    %107 = vector.broadcast %106 : vector<1x32xf32> to vector<16x32xf32>
    %108 = arith.addf %104, %107 : vector<16x32xf32>
    %c2_69 = arith.constant 2 : index
    %c0_70 = arith.constant 0 : index
    %c0_71 = arith.constant 0 : index
    %109 = vector.load %arg6[%c2_69, %c0_70, %c0_71] : memref<3x32x32xbf16, #tpu.memory_space<vmem>>, vector<1x32x32xbf16>
    %110 = vector.shape_cast %109 : vector<1x32x32xbf16> to vector<32x32xbf16>
    %cst_72 = arith.constant dense<0.000000e+00> : vector<16x32xf32>
    %111 = tpu.matmul %3, %110, %cst_72 {dimension_numbers = #tpu.dot_dimension_numbers<[1], [0], [0], [1], [0, 0, 1, 1], [], []>} : vector<16x32xbf16>, vector<32x32xbf16>, vector<16x32xf32> -> vector<16x32xf32>
    %c2_73 = arith.constant 2 : index
    %c0_74 = arith.constant 0 : index
    %c0_75 = arith.constant 0 : index
    %112 = vector.load %arg7[%c2_73, %c0_74, %c0_75] : memref<3x1x32xf32, #tpu.memory_space<vmem>>, vector<1x1x32xf32>
    %113 = vector.shape_cast %112 : vector<1x1x32xf32> to vector<1x32xf32>
    %114 = vector.broadcast %113 : vector<1x32xf32> to vector<16x32xf32>
    %115 = arith.addf %111, %114 : vector<16x32xf32>
    %116 = tpu.concatenate %108, %108, %108, %108 in 0 : vector<16x32xf32>, vector<16x32xf32>, vector<16x32xf32>, vector<16x32xf32> -> vector<64x32xf32>
    %117 = arith.mulf %116, %0 : vector<64x32xf32>
    %118 = tpu.concatenate %115, %115, %115, %115 in 0 : vector<16x32xf32>, vector<16x32xf32>, vector<16x32xf32>, vector<16x32xf32> -> vector<64x32xf32>
    %119 = arith.mulf %118, %0 : vector<64x32xf32>
    %120 = arith.truncf %119 : vector<64x32xf32> to vector<64x32xbf16>
    %cst_76 = arith.constant dense<0.000000e+00> : vector<16x64xf32>
    %121 = tpu.matmul %19, %117, %cst_76 {dimension_numbers = #tpu.dot_dimension_numbers<[1], [1], [0], [0], [0, 0, 1, 0], [], []>} : vector<16x32xf32>, vector<64x32xf32>, vector<16x64xf32> -> vector<16x64xf32>
    %c0_77 = arith.constant 0 : index
    %c0_78 = arith.constant 0 : index
    %122 = vector.load %arg11[%c0_77, %c0_78] : memref<16x64xi8, #tpu.memory_space<vmem>>, vector<16x64xi8>
    %123 = arith.sitofp %122 : vector<16x64xi8> to vector<16x64xf32>
    %124 = arith.mulf %121, %123 : vector<16x64xf32>
    %cst_79 = arith.constant 1.000000e+00 : f32
    %125 = vector.broadcast %cst_79 : f32 to vector<16x64xf32>
    %126 = arith.subf %125, %123 : vector<16x64xf32>
    %cst_80 = arith.constant 1.000000e+30 : f32
    %127 = vector.broadcast %cst_80 : f32 to vector<16x64xf32>
    %128 = arith.mulf %126, %127 : vector<16x64xf32>
    %129 = arith.subf %124, %128 : vector<16x64xf32>
    %cst_81 = arith.constant dense<0xFF800000> : vector<16xf32>
    %130 = vector.multi_reduction <maximumf>, %129, %cst_81 [1] : vector<16x64xf32> to vector<16xf32>
    %131 = vector.shape_cast %130 : vector<16xf32> to vector<16x1xf32>
    %132 = vector.broadcast %131 : vector<16x1xf32> to vector<16x64xf32>
    %133 = arith.subf %129, %132 : vector<16x64xf32>
    %134 = math.exp %133 : vector<16x64xf32>
    %135 = arith.mulf %134, %123 : vector<16x64xf32>
    %136 = arith.truncf %135 : vector<16x64xf32> to vector<16x64xbf16>
    %cst_82 = arith.constant dense<0.000000e+00> : vector<16x32xf32>
    %137 = tpu.matmul %136, %120, %cst_82 {dimension_numbers = #tpu.dot_dimension_numbers<[1], [0], [0], [1], [0, 0, 1, 1], [], []>} : vector<16x64xbf16>, vector<64x32xbf16>, vector<16x32xf32> -> vector<16x32xf32>
    %cst_83 = arith.constant dense<0.000000e+00> : vector<16x32xf32>
    %138 = tpu.matmul %136, %1, %cst_83 {dimension_numbers = #tpu.dot_dimension_numbers<[1], [0], [0], [1], [0, 0, 1, 1], [], []>} : vector<16x64xbf16>, vector<64x32xbf16>, vector<16x32xf32> -> vector<16x32xf32>
    %cst_84 = arith.constant 1.000000e-30 : f32
    %139 = vector.broadcast %cst_84 : f32 to vector<16x32xf32>
    %140 = arith.maximumf %138, %139 : vector<16x32xf32>
    %141 = tpu.reciprocal %140 {approx = true} : vector<16x32xf32> -> vector<16x32xf32>
    %142 = arith.mulf %137, %141 : vector<16x32xf32>
    %143 = arith.addf %60, %142 : vector<16x32xf32>
    %144 = arith.truncf %101 : vector<16x32xf32> to vector<16x32xbf16>
    %c0_85 = arith.constant 0 : index
    %c0_86 = arith.constant 0 : index
    %c0_87 = arith.constant 0 : index
    %145 = vector.load %arg12[%c0_85, %c0_86, %c0_87] : memref<2x32x32xbf16, #tpu.memory_space<vmem>>, vector<1x32x32xbf16>
    %146 = vector.shape_cast %145 : vector<1x32x32xbf16> to vector<32x32xbf16>
    %cst_88 = arith.constant dense<0.000000e+00> : vector<16x32xf32>
    %147 = tpu.matmul %144, %146, %cst_88 {dimension_numbers = #tpu.dot_dimension_numbers<[1], [0], [0], [1], [0, 0, 1, 1], [], []>} : vector<16x32xbf16>, vector<32x32xbf16>, vector<16x32xf32> -> vector<16x32xf32>
    %c0_89 = arith.constant 0 : index
    %c0_90 = arith.constant 0 : index
    %c0_91 = arith.constant 0 : index
    %148 = vector.load %arg13[%c0_89, %c0_90, %c0_91] : memref<2x1x32xf32, #tpu.memory_space<vmem>>, vector<1x1x32xf32>
    %149 = vector.shape_cast %148 : vector<1x1x32xf32> to vector<1x32xf32>
    %150 = vector.broadcast %149 : vector<1x32xf32> to vector<16x32xf32>
    %151 = arith.addf %147, %150 : vector<16x32xf32>
    %c0_92 = arith.constant 0 : index
    %c0_93 = arith.constant 0 : index
    %152 = vector.load %arg14[%c0_92, %c0_93] : memref<2x1xf32, #tpu.memory_space<vmem>>, vector<1x1xf32>
    %153 = vector.broadcast %152 : vector<1x1xf32> to vector<16x32xf32>
    %154 = arith.mulf %2, %153 : vector<16x32xf32>
    %155 = arith.addf %151, %154 : vector<16x32xf32>
    %c0_94 = arith.constant 0 : index
    %c0_95 = arith.constant 0 : index
    %156 = vector.load %arg15[%c0_94, %c0_95] : memref<16x32xf32, #tpu.memory_space<vmem>>, vector<16x32xf32>
    tpu.vector_store %arg15[%c0_94, %c0_95], %155 {strides = array<i32>} : memref<16x32xf32, #tpu.memory_space<vmem>>, vector<16x32xf32>,
    %157 = arith.truncf %143 : vector<16x32xf32> to vector<16x32xbf16>
    %c1_96 = arith.constant 1 : index
    %c0_97 = arith.constant 0 : index
    %c0_98 = arith.constant 0 : index
    %158 = vector.load %arg12[%c1_96, %c0_97, %c0_98] : memref<2x32x32xbf16, #tpu.memory_space<vmem>>, vector<1x32x32xbf16>
    %159 = vector.shape_cast %158 : vector<1x32x32xbf16> to vector<32x32xbf16>
    %cst_99 = arith.constant dense<0.000000e+00> : vector<16x32xf32>
    %160 = tpu.matmul %157, %159, %cst_99 {dimension_numbers = #tpu.dot_dimension_numbers<[1], [0], [0], [1], [0, 0, 1, 1], [], []>} : vector<16x32xbf16>, vector<32x32xbf16>, vector<16x32xf32> -> vector<16x32xf32>
    %c1_100 = arith.constant 1 : index
    %c0_101 = arith.constant 0 : index
    %c0_102 = arith.constant 0 : index
    %161 = vector.load %arg13[%c1_100, %c0_101, %c0_102] : memref<2x1x32xf32, #tpu.memory_space<vmem>>, vector<1x1x32xf32>
    %162 = vector.shape_cast %161 : vector<1x1x32xf32> to vector<1x32xf32>
    %163 = vector.broadcast %162 : vector<1x32xf32> to vector<16x32xf32>
    %164 = arith.addf %160, %163 : vector<16x32xf32>
    %c1_103 = arith.constant 1 : index
    %c0_104 = arith.constant 0 : index
    %165 = vector.load %arg14[%c1_103, %c0_104] : memref<2x1xf32, #tpu.memory_space<vmem>>, vector<1x1xf32>
    %166 = vector.broadcast %165 : vector<1x1xf32> to vector<16x32xf32>
    %167 = arith.mulf %11, %166 : vector<16x32xf32>
    %168 = arith.addf %164, %167 : vector<16x32xf32>
    %c0_105 = arith.constant 0 : index
    %c0_106 = arith.constant 0 : index
    %169 = vector.load %arg16[%c0_105, %c0_106] : memref<16x32xf32, #tpu.memory_space<vmem>>, vector<16x32xf32>
    tpu.vector_store %arg16[%c0_105, %c0_106], %168 {strides = array<i32>} : memref<16x32xf32, #tpu.memory_space<vmem>>, vector<16x32xf32>,
    return
  }
}

</mosaic_0001>

<bundles_post_ra>
// kernel: tpu_custom_call.1
= control target key start
LH: loop header
LB: loop body
LE: loop exit
PB: predicated region body
PF: predicated region fallthrough
CT: control target
= control target key end

     0   :  { %s1940_s0 = inlined_call_operand.hbm [shape: f32[16,32], index: 0, kind: input, shape index: {}]   ;;  %s1941_s1 = inlined_call_operand.hbm [shape: f32[16,32], index: 1, kind: input, shape index: {}]   ;;  %s1942_s2 = inlined_call_operand.hbm [shape: bf16[2,32,32], index: 2, kind: input, shape index: {}]   ;;  %s1943_s3 = inlined_call_operand.hbm [shape: f32[2,1,32], index: 3, kind: input, shape index: {}]   ;;  %s1944_s4 = inlined_call_operand.vmem [shape: bf16[3,32,32], index: 4, kind: input, shape index: {}]   ;;  %s1945_s5 = inlined_call_operand.vmem [shape: f32[3,1,32], index: 5, kind: input, shape index: {}]   ;;  %s1946_s6 = inlined_call_operand.vmem [shape: bf16[3,32,32], index: 6, kind: input, shape index: {}]   ;;  %s1947_s7 = inlined_call_operand.hbm [shape: f32[3,1,32], index: 7, kind: input, shape index: {}]   ;;  %s1948_s8 = inlined_call_operand.vmem [shape: f32[64,32], index: 8, kind: input, shape index: {}]   ;;  %s1949_s9 = inlined_call_operand.vmem [shape: s8[16,64], index: 9, kind: input, shape index: {}]   ;;  %s1950_s10 = inlined_call_operand.vmem [shape: s8[16,64], index: 10, kind: input, shape index: {}]   ;;  %s1951_s11 = inlined_call_operand.hbm [shape: s8[16,64], index: 11, kind: input, shape index: {}]   ;;  %s1952_s12 = inlined_call_operand.hbm [shape: bf16[2,32,32], index: 12, kind: input, shape index: {}]   ;;  %s1953_s13 = inlined_call_operand.vmem [shape: f32[2,1,32], index: 13, kind: input, shape index: {}]   ;;  %s1954_s14 = inlined_call_operand.vmem [shape: f32[2,1], index: 14, kind: input, shape index: {}]   ;;  %s1955_s15 = inlined_call_operand.hbm [shape: f32[16,32], index: 15, kind: output, shape index: {0}]   ;;  %s1956_s16 = inlined_call_operand.hbm [shape: f32[16,32], index: 16, kind: output, shape index: {1}]  }
   0x1   :  { %1961 = sst [smem:[#allocation23_spill]] %s1940_s0 }
   0x2   :  { %1962 = sst [smem:[#allocation24_spill]] %s1956_s16 }
   0x3   :  { %22 = vsyncpa [#allocation3], 0 }
   0x4   :  { %23 = vsyncpa [#allocation6], 0 }
   0x5   :  { %24 = vsyncpa [#allocation9], 0 }
   0x6   :  { %25 = vsyncpa [#allocation12], 0 }
   0x7   :  { %26 = vsyncpa [#allocation4], 0 }
   0x8   :  { %27 = vsyncpa [#allocation16], 0  ;;  %s45_s23 = sshll.u32 %s1941_s1, 4  ;;  %s1485_s24 = smov [#allocation5]   ;;  %s46_s23 = int_to_ptr.hbm [resolvable:$true] %s45_s23 }
   0x9   :  { %s47_s25 = sshll.u32 %s1485_s24, 4  ;;  %s71_s28 = sshll.u32 %s1943_s3, 4  ;;  %s48_s25 = int_to_ptr.vmem [resolvable:$true] %s47_s25  ;;  %s72_s28 = int_to_ptr.hbm [resolvable:$true] %s71_s28 }
   0xa   :  { %s1957_s29 = smov 128   ;;  %s1959_s30 = smov 8  }
   0xb   :  { %53 = dma.hbm_to_vmem [thread:$0]  %s46_s23, 256, %s48_s25, [#allocation6], %s1957_s29, %s1957_s29, %s1959_s30  }
   0xc   :  { %s1488_s0 = smov [#allocation8]   ;;  %s1489_s18 = smov 16  }
   0xd   :  { %s73_s17 = sshll.u32 %s1488_s0, 4  ;;  %s1490_s1 = smov 1   ;;  %s74_s17 = int_to_ptr.vmem [resolvable:$true] %s73_s17 }
   0xe   :  { %79 = dma.hbm_to_vmem [thread:$0]  %s72_s28, 32, %s74_s17, [#allocation9], %s1489_s18, %s1489_s18, %s1490_s1  }
   0xf   :  { %s109_s3 = sshll.u32 %s1951_s11, 4  ;;  %s1491_s21 = smov [#allocation11]   ;;  %s110_s3 = int_to_ptr.hbm [resolvable:$true] %s109_s3 }
  0x10   :  { %s111_s22 = sshll.u32 %s1491_s21, 4  ;;  %s1963_s25 = sld [smem:[#allocation23_spill]]  ;;  %s112_s22 = int_to_ptr.vmem [resolvable:$true] %s111_s22 }
  0x11   :  { %s1492_s27 = smov 32   ;;  %s1493_s0 = smov 2  }
  0x12   :  { %117 = dma.hbm_to_vmem [thread:$0]  %s110_s3, 64, %s112_s22, [#allocation12], %s1492_s27, %s1492_s27, %s1493_s0  }
  0x13   :  { %s1494_s29 = smov [#allocation2]   ;;  %s58_s17 = sshll.u32 %s1942_s2, 4  ;;  %s59_s17 = int_to_ptr.hbm [resolvable:$true] %s58_s17 }
  0x14   :  { %s34_s30 = sshll.u32 %s1494_s29, 4  ;;  %s1964_s11 = smov 8   ;;  %s35_s30 = int_to_ptr.vmem [resolvable:$true] %s34_s30 }
  0x15   :  { %s1965_s19 = smov 128   ;;  %s1495_s20 = smov [#allocation7]  }
  0x16   :  { %s32_s26 = sshll.u32 %s1963_s25, 4  ;;  %s60_s21 = sshll.u32 %s1495_s20, 4  ;;  %s33_s26 = int_to_ptr.hbm [resolvable:$true] %s32_s26  ;;  %s61_s21 = int_to_ptr.vmem [resolvable:$true] %s60_s21 }
  0x17   :  { %40 = dma.hbm_to_vmem [thread:$0]  %s33_s26, 256, %s35_s30, [#allocation3], %s1965_s19, %s1965_s19, %s1964_s11  }
  0x18   :  { %s90_s3 = sshll.u32 %s1947_s7, 4  ;;  %s1496_s22 = smov 64   ;;  %s91_s3 = int_to_ptr.hbm [resolvable:$true] %s90_s3 }
  0x19   :  { %s1497_s25 = smov 4   ;;  %s1498_s29 = smov [#allocation10]  }
  0x1a   :  { %66 = dma.hbm_to_vmem [thread:$0]  %s59_s17, 512, %s61_s21, [#allocation6], %s1496_s22, %s1496_s22, %s1497_s25  }
  0x1b   :  { %s92_s16 = sshll.u32 %s1498_s29, 4  ;;  %s122_s0 = sshll.u32 %s1952_s12, 4  ;;  %s93_s16 = int_to_ptr.vmem [resolvable:$true] %s92_s16  ;;  %s123_s0 = int_to_ptr.hbm [resolvable:$true] %s122_s0 }
  0x1c   :  { %98 = dma.hbm_to_vmem [thread:$0]  %s91_s3, 48, %s93_s16, [#allocation9], %s1489_s18, %s1489_s18, %s1490_s1  }
  0x1d   :  { %s1499_s30 = smov [#allocation13]  }
  0x1e   :  { %s124_s26 = sshll.u32 %s1499_s30, 4  ;;  %s125_s26 = int_to_ptr.vmem [resolvable:$true] %s124_s26 }
  0x1f   :  { %130 = dma.hbm_to_vmem [thread:$0]  %s123_s0, 512, %s125_s26, [#allocation12], %s1496_s22, %s1496_s22, %s1497_s25  }
  0x20   :  { %1473 = dma.done.wait [#allocation3], 256  }
  0x21   :  { %1474 = vsyncadd [#allocation3], 4294967040 }
  0x22   :  { %1475 = dma.done.wait [#allocation6], 768  }
  0x23   :  { %1476 = vsyncadd [#allocation6], 4294966528 }
  0x24   :  { %1477 = dma.done.wait [#allocation9], 80  }
  0x25   :  { %1478 = vsyncadd [#allocation9], 4294967216 }
  0x26   :  { %1479 = dma.done.wait [#allocation12], 576  }
  0x27   :  { %1480 = vsyncadd [#allocation12], 4294966720  ;;  %v1175_v0 = vld [vmem:[%s1944_s4 + $0x8] sm:$0xff]  ;;  %v1174_v1 = vld [vmem:[%s1944_s4] sm:$0xff]  ;;  %vm199_vm0 = vcmask 261120   ;;  %vm414_vm1 = vcmask 523264  }
  0x28   :  { %v1626_v2 = vld [vmem:[#allocation2] sm:$0xff]  ;;  %v1628_v3 = vld [vmem:[#allocation2 + $0x8] sm:$0xff]  ;;  %v1173_v4 = vld [vmem:[#allocation7 + $0x18] sm:$0xff]  ;;  %285 = vmatpush.bf16.msra.mxu2 %v1175_v0  ;;  %s991_s25 = sshll.u32 %s1955_s15, 4  ;;  %s1501_s15 = smov [#allocation15]   ;;  %s992_s25 = int_to_ptr.hbm [resolvable:$true] %s991_s25 }
  0x29   :  { %v1172_v5 = vld [vmem:[#allocation7 + $0x10] sm:$0xff]  ;;  %251 = vmatpush.bf16.msra.mxu1 %v1173_v4  ;;  %v1632_v7 = vld [vmem:[#allocation5 + $0x8] sm:$0xff]  ;;  %v1636_v8 = vpack.c.bf16 %v1628_v3, %v1626_v2  ;;  %v1171_v10 = vld [vmem:[#allocation7 + $0x8] sm:$0xff]  ;;  %s1002_s27 = sshll.u32 %s1501_s15, 4  ;;  %s1966_s26 = sld [smem:[#allocation24_spill]]  ;;  %s1003_s27 = int_to_ptr.vmem [resolvable:$true] %s1002_s27 }
  0x2a   :  { %v1630_v6 = vld [vmem:[#allocation5] sm:$0xff]  ;;  %209 = vmatpush.bf16.msra.mxu0 %v1171_v10  ;;  %v1170_v11 = vld [vmem:[#allocation7] sm:$0xff]  ;;  %v1654_v15 = vld [vmem:[%s1948_s8 + $0x38] sm:$0xff] }
  0x2b   :  { %v1640_v9 = vpack.c.bf16 %v1632_v7, %v1630_v6  ;;  %v1223_v13 = vld [vmem:[%s1945_s5] ss:$0 sm:$0xff]  ;;  %v1660_v19 = vld [vmem:[%s1948_s8 + $0x30] sm:$0xff]  ;;  %v1667_v21 = vld [vmem:[%s1948_s8 + $0x28] sm:$0xff] }
  0x2c   :  { %286 = vmatpush.bf16.msra.mxu2 %v1174_v1  ;;  %v1674_v23 = vld [vmem:[%s1948_s8 + $0x20] sm:$0xff]  ;;  %v1177_v24 = vld [vmem:[%s1946_s6 + $0x8] sm:$0xff]  ;;  %v1179_v27 = vld [vmem:[%s1944_s4 + $0x18] sm:$0xff]  ;;  %v1735_v43 = vpack.c.bf16 %v1654_v15, %v1660_v19 }
  0x2d   :  { %252 = vmatpush.bf16.msra.mxu1 %v1172_v5  ;;  %319 = vmatpush.bf16.msra.mxu3 %v1177_v24  ;;  %v1176_v25 = vld [vmem:[%s1946_s6] sm:$0xff]  ;;  %v1690_v28 = vld [vmem:[%s1948_s8 + $0x18] sm:$0xff]  ;;  %v1178_v30 = vld [vmem:[%s1944_s4 + $0x10] sm:$0xff]  ;;  %v1743_v45 = vpack.c.bf16 %v1667_v21, %v1674_v23 }
  0x2e   :  { %210 = vmatpush.bf16.msra.mxu0 %v1170_v11  ;;  %v1700_v31 = vld [vmem:[%s1948_s8 + $0x10] sm:$0xff]  ;;  %v1709_v33 = vld [vmem:[%s1948_s8 + $0x8] sm:$0xff]  ;;  %v1224_v35 = vld [vmem:[#allocation8 + $0x1] ss:$0 sm:$0xff] }
  0x2f   :  { %1051 = vmatmul.msk.bf16.vlgmr.msra.gmra.mxu2 %vm199_vm0, %v1636_v8  ;;  %v1716_v36 = vld [vmem:[%s1948_s8] sm:$0xff]  ;;  %v1749_v47 = vpack.c.bf16 %v1690_v28, %v1700_v31 }
  0x30   :  { %1042 = vmatmul.msk.bf16.vlgmr.msra.gmra.mxu1 %vm199_vm0, %v1640_v9  ;;  %v1191_v44 = vld [vmem:[%s1949_s9] sm:$0xf]   ;;  %451 = vmatpush.bf16.msrb.mxu2 %v1735_v43  ;;  %v1759_v52 = vpack.c.bf16 %v1709_v33, %v1716_v36 }
  0x31   :  { %1033 = vmatmul.msk.bf16.vlgmr.msra.gmra.mxu0 %vm199_vm0, %v1636_v8  ;;  %320 = vmatpush.bf16.msra.mxu3 %v1176_v25  ;;  %v1192_v46 = vunpack.c.0.s8 %v1191_v44  ;;  %v1226_v51 = vld [vmem:[#allocation10] ss:$0 sm:$0xff]  ;;  %v1193_v54 = vunpack.c.1.s8 %v1191_v44 }
  0x33   :  { %v1752_v48 = vcvt.s32.f32 %v1192_v46  ;;  %v1765_v57 = vcvt.s32.f32 %v1193_v54 }
  0x34   :  { %1060 = vmatmul.msk.bf16.vlgmr.msra.gmra.mxu3 %vm199_vm0, %v1636_v8  ;;  %452 = vmatpush.bf16.msrb.mxu2 %v1743_v45 }
  0x35   :  { %495 = vmatpush.bf16.msrb.mxu3 %v1179_v27  ;;  %v408_v53 = vsub.f32 1.0, %v1752_v48  ;;  %v409_v5 = vsub.f32 1.0, %v1765_v57  ;;  %v1227_v27 = vld [vmem:[%s1945_s5 + $0x1] ss:$0 sm:$0xff] }
  0x37   :  { %v410_v56 = vmul.f32 1e+30, %v408_v53 }
  0x38   :  { %453 = vmatpush.bf16.msrb.mxu2 %v1749_v47 }
  0x39   :  { %496 = vmatpush.bf16.msrb.mxu3 %v1178_v30 }
  0x3c   :  { %454 = vmatpush.bf16.msrb.mxu2 %v1759_v52 }
  0x44   :  { %1086 = vmatmul.msk.bf16.vlgmr.msrb.gmra.mxu3 %vm199_vm0, %v1640_v9 }
  0xad   :  { %v254_v37 = vpop.f32.mrf.mxu1 }
  0xae   :  { %v1720_v39 = vadd.f32 %v1224_v35, %v254_v37  ;;  %v1731_v42 = vpop.f32.mrf.mxu0 }
  0xb2   :  { %v288_v12 = vpop.f32.mrf.mxu2 }
  0xb3   :  { %v289_v17 = vadd.f32 %v1223_v13, %v288_v12 }
  0xb5   :  { %v333_v20 = vmul.f32 %v289_v17, %v1660_v19  ;;  %v331_v26 = vmul.f32 %v289_v17, %v1674_v23  ;;  %v329_v32 = vmul.f32 %v289_v17, %v1700_v31  ;;  %v327_v38 = vmul.f32 %v289_v17, %v1716_v36  ;;  %v256_v40 = vpop.f32.mrf.mxu1 }
  0xb6   :  { %v1727_v41 = vadd.f32 %v1224_v35, %v256_v40  ;;  %v1754_v50 = vpop.f32.mrf.mxu0 }
  0xb7   :  { %v322_v49 = vpop.f32.mrf.mxu3 }
  0xb8   :  { %v323_v55 = vadd.f32 %v1226_v51, %v322_v49 }
  0xba   :  { %v290_v14 = vpop.f32.mrf.mxu2  ;;  %v341_v61 = vmul.f32 %v323_v55, %v1660_v19  ;;  %v339_v0 = vmul.f32 %v323_v55, %v1674_v23  ;;  %v335_v24 = vmul.f32 %v323_v55, %v1716_v36 }
  0xbb   :  { %v291_v16 = vadd.f32 %v1223_v13, %v290_v14  ;;  %v337_v13 = vmul.f32 %v323_v55, %v1700_v31 }
  0xbd   :  { %v334_v18 = vmul.f32 %v291_v16, %v1654_v15  ;;  %v332_v22 = vmul.f32 %v291_v16, %v1667_v21  ;;  %v330_v29 = vmul.f32 %v291_v16, %v1690_v28  ;;  %v328_v34 = vmul.f32 %v291_v16, %v1709_v33 }
  0xbe   :  { %v411_v16 = vmul.f32 1e+30, %v409_v5  ;;  %v1183_v5 = vld [vmem:[%s1944_s4 + $0x28] sm:$0xff] }
  0xbf   :  { %1061 = vmatpush.xpose.msk.msrb.mxu0 %vm199_vm0, %v334_v18  ;;  %v324_v58 = vpop.f32.mrf.mxu3 }
  0xc0   :  { %v325_v60 = vadd.f32 %v1226_v51, %v324_v58 }
  0xc2   :  { %v342_v63 = vmul.f32 %v325_v60, %v1654_v15  ;;  %v340_v1 = vmul.f32 %v325_v60, %v1667_v21  ;;  %v338_v14 = vmul.f32 %v325_v60, %v1690_v28  ;;  %v336_v25 = vmul.f32 %v325_v60, %v1709_v33 }
  0xc3   :  { %1062 = vmatpush.xpose.msk.msrb.mxu0 %vm199_vm0, %v333_v20 }
  0xc4   :  { %v346_v10 = vpack.c.bf16 %v342_v63, %v341_v61  ;;  %v345_v12 = vpack.c.bf16 %v340_v1, %v339_v0  ;;  %v343_v30 = vpack.c.bf16 %v336_v25, %v335_v24  ;;  %v1181_v61 = vld [vmem:[%s1946_s6 + $0x18] sm:$0xff]  ;;  %v1180_v63 = vld [vmem:[%s1946_s6 + $0x10] sm:$0xff]  ;;  %v1228_v24 = vld [vmem:[#allocation10 + $0x1] ss:$0 sm:$0xff] }
  0xc6   :  { %437 = vmatpush.bf16.msrb.mxu1 %v346_v10 }
  0xc7   :  { %1063 = vmatpush.xpose.msk.msrb.mxu0 %vm199_vm0, %v332_v22  ;;  %v498_v17 = vpop.f32.mrf.mxu3  ;;  %v344_v22 = vpack.c.bf16 %v338_v14, %v337_v13 }
  0xca   :  { %438 = vmatpush.bf16.msrb.mxu1 %v345_v12 }
  0xcb   :  { %1064 = vmatpush.xpose.msk.msrb.mxu0 %vm199_vm0, %v331_v26 }
  0xce   :  { %439 = vmatpush.bf16.msrb.mxu1 %v344_v22 }
  0xcf   :  { %1065 = vmatpush.xpose.msk.msrb.mxu0 %vm199_vm0, %v330_v29 }
  0xd2   :  { %440 = vmatpush.bf16.msrb.mxu1 %v343_v30 }
  0xd3   :  { %1066 = vmatpush.xpose.msk.msrb.mxu0 %vm199_vm0, %v329_v32  ;;  %v500_v32 = vpop.f32.mrf.mxu3 }
  0xd4   :  { %v501_v35 = vadd.f32 %v1227_v27, %v500_v32 }
  0xd6   :  { %v546_v37 = vmul.f32 %v501_v35, %v1654_v15  ;;  %v544_v40 = vmul.f32 %v501_v35, %v1667_v21  ;;  %v542_v46 = vmul.f32 %v501_v35, %v1690_v28  ;;  %v540_v51 = vmul.f32 %v501_v35, %v1709_v33  ;;  %531 = vmatpush.bf16.msra.mxu1 %v1181_v61 }
  0xd7   :  { %1067 = vmatpush.xpose.msk.msrb.mxu0 %vm199_vm0, %v328_v34  ;;  %v499_v34 = vadd.f32 %v1227_v27, %v498_v17 }
  0xd8   :  { %1100 = vmatpush.xpose.msk.msra.mxu2 %vm199_vm0, %v546_v37 }
  0xd9   :  { %v543_v44 = vmul.f32 %v499_v34, %v1674_v23  ;;  %v541_v49 = vmul.f32 %v499_v34, %v1700_v31  ;;  %v539_v53 = vmul.f32 %v499_v34, %v1716_v36 }
  0xda   :  { %532 = vmatpush.bf16.msra.mxu1 %v1180_v63 }
  0xdb   :  { %1068 = vmatpush.xpose.msk.msrb.mxu0 %vm199_vm0, %v327_v38  ;;  %v545_v38 = vmul.f32 %v499_v34, %v1660_v19 }
  0xdd   :  { %1101 = vmatpush.xpose.msk.msra.mxu2 %vm199_vm0, %v545_v38 }
  0xde   :  { %1069 = vmatmul.msk.f32.vlgmr.msrb.gmra.mxu0 %vm199_vm0, %v1720_v39 }
  0xdf   :  { %662 = vmatpush.bf16.msra.mxu0 %v1735_v43 }
  0xe1   :  { %1102 = vmatpush.xpose.msk.msra.mxu2 %vm199_vm0, %v544_v40 }
  0xe3   :  { %663 = vmatpush.bf16.msra.mxu0 %v1743_v45 }
  0xe5   :  { %1103 = vmatpush.xpose.msk.msra.mxu2 %vm199_vm0, %v543_v44 }
  0xe6   :  { %1070 = vmatmul.msk.f32.gmra.mxu0 %vm199_vm0, %v1727_v41 }
  0xe7   :  { %664 = vmatpush.bf16.msra.mxu0 %v1749_v47 }
  0xe9   :  { %1104 = vmatpush.xpose.msk.msra.mxu2 %vm199_vm0, %v542_v46 }
  0xeb   :  { %665 = vmatpush.bf16.msra.mxu0 %v1759_v52 }
  0xed   :  { %1105 = vmatpush.xpose.msk.msra.mxu2 %vm199_vm0, %v541_v49 }
  0xf1   :  { %1106 = vmatpush.xpose.msk.msra.mxu2 %vm199_vm0, %v540_v51 }
  0xf5   :  { %1107 = vmatpush.xpose.msk.msra.mxu2 %vm199_vm0, %v539_v53 }
 0x15b   :  { %v394_v59 = vpop.f32.mrf.mxu0 }
 0x15c   :  { %v406_v62 = vmul.f32 %v1752_v48, %v394_v59 }
 0x15e   :  { %v412_v4 = vsub.f32 %v406_v62, %v410_v56 }
 0x160   :  { %v415_v11 = vsel %vm414_vm1, %v412_v4, -inf }
 0x161   :  { %416 = vmax.xlane.f32.xlu0 %v415_v11  ;;  %v1182_v11 = vld [vmem:[%s1944_s4 + $0x20] sm:$0xff]  ;;  %s1004_s4 = sshll.u32 %s1966_s26, 4  ;;  %s1005_s4 = int_to_ptr.hbm [resolvable:$true] %s1004_s4 }
 0x163   :  { %v397_v18 = vpop.f32.mrf.mxu0 }
 0x164   :  { %v407_v20 = vmul.f32 %v1765_v57, %v397_v18 }
 0x166   :  { %v413_v26 = vsub.f32 %v407_v20, %v411_v16 }
 0x168   :  { %v418_v29 = vsel %vm414_vm1, %v413_v26, -inf }
 0x169   :  { %419 = vmax.xlane.f32.xlu0 %v418_v29 }
 0x1d4   :  { %v417_v54 = vpop.xlane.xlu0 %416 }
 0x1d5   :  { %v421_v55 = vsub.f32 %v412_v4, %v417_v54 }
 0x1d7   :  { %v423_v56 = vmul.f32 1.442695, %v421_v55 }
 0x1d9   :  { %1233 = vpow2.f32 %v423_v56 }
 0x1dc   :  { %v420_v58 = vpop.xlane.xlu0 %419 }
 0x1dd   :  { %v422_v59 = vsub.f32 %v413_v26, %v420_v58 }
 0x1df   :  { %v425_v60 = vmul.f32 1.442695, %v422_v59  ;;  %v1234_v62 = vpop.eup %1233 }
 0x1e0   :  { %v427_v1 = vmul.f32 %v1234_v62, %v1752_v48  ;;  %v1225_v48 = vld [vmem:[#allocation8] ss:$0 sm:$0xff] }
 0x1e1   :  { %1235 = vpow2.f32 %v425_v60  ;;  %v215_v12 = vadd.f32 %v1225_v48, %v1754_v50 }
 0x1e7   :  { %v1236_v0 = vpop.eup %1235 }
 0x1e8   :  { %v428_v4 = vmul.f32 %v1236_v0, %v1765_v57  ;;  %v213_v57 = vadd.f32 %v1225_v48, %v1731_v42 }
 0x1ea   :  { %v429_v10 = vpack.c.bf16 %v428_v4, %v427_v1 }
 0x1ec   :  { %1071 = vmatmul.msk.bf16.vlgmr.msrb.gmra.mxu1 %vm414_vm1, %v429_v10  ;;  %1072 = vmatmul.msk.bf16.vlgmr.msrb.gmra.mxu2 %vm414_vm1, %v429_v10  ;;  %v1229_v10 = vld [vmem:[%s1945_s5 + $0x2] ss:$0 sm:$0xff] }
 0x1ed   :  { %706 = vmatpush.bf16.msrb.mxu1 %v1183_v5  ;;  %867 = vmatpush.bf16.msrb.mxu2 %v1735_v43 }
 0x1f1   :  { %707 = vmatpush.bf16.msrb.mxu1 %v1182_v11  ;;  %868 = vmatpush.bf16.msrb.mxu2 %v1743_v45 }
 0x1f5   :  { %869 = vmatpush.bf16.msrb.mxu2 %v1749_v47  ;;  %v1195_v47 = vld [vmem:[%s1950_s10] sm:$0xf]  }
 0x1f6   :  { %v1196_v13 = vunpack.c.0.s8 %v1195_v47  ;;  %v1197_v22 = vunpack.c.1.s8 %v1195_v47 }
 0x1f8   :  { %v1830_v14 = vcvt.s32.f32 %v1196_v13  ;;  %v1835_v26 = vcvt.s32.f32 %v1197_v22 }
 0x1f9   :  { %870 = vmatpush.bf16.msrb.mxu2 %v1759_v52 }
 0x1fa   :  { %v620_v20 = vsub.f32 1.0, %v1830_v14  ;;  %v621_v38 = vsub.f32 1.0, %v1835_v26 }
 0x1fc   :  { %1108 = vmatmul.msk.f32.vlgmr.msra.gmra.mxu2 %vm199_vm0, %v213_v57  ;;  %1099 = vmatmul.msk.bf16.vlgmr.msra.gmra.mxu1 %vm199_vm0, %v1640_v9  ;;  %v622_v25 = vmul.f32 1e+30, %v620_v20  ;;  %v623_v54 = vmul.f32 1e+30, %v621_v38 }
 0x204   :  { %1109 = vmatmul.msk.f32.gmra.mxu2 %vm199_vm0, %v215_v12 }
 0x20c   :  { %1125 = vmatmul.msk.bf16.vlgmr.msrb.gmra.mxu1 %vm199_vm0, %v1636_v8 }
 0x269   :  { %v442_v43 = vpop.f32.mrf.mxu1 }
 0x26f   :  { %v456_v45 = vpop.f32.mrf.mxu2 }
 0x270   :  { %v461_v52 = vmax.f32 %v456_v45, 1e-30 }
 0x271   :  { %v444_v42 = vpop.f32.mrf.mxu1 }
 0x272   :  { %1237 = vrcp.f32 %v461_v52 }
 0x277   :  { %v458_v9 = vpop.f32.mrf.mxu2 }
 0x278   :  { %v1238_v16 = vpop.eup %1237  ;;  %v462_v50 = vmax.f32 %v458_v9, 1e-30 }
 0x279   :  { %v1832_v17 = vmul.f32 %v1238_v16, %v442_v43  ;;  %v534_v18 = vpop.f32.mrf.mxu1 }
 0x27a   :  { %1239 = vrcp.f32 %v462_v50  ;;  %v535_v27 = vadd.f32 %v1228_v24, %v534_v18 }
 0x27c   :  { %v553_v40 = vmul.f32 %v535_v27, %v1660_v19  ;;  %v551_v51 = vmul.f32 %v535_v27, %v1674_v23  ;;  %v549_v60 = vmul.f32 %v535_v27, %v1700_v31  ;;  %v547_v4 = vmul.f32 %v535_v27, %v1716_v36  ;;  %v1185_v27 = vld [vmem:[%s1946_s6 + $0x28] sm:$0xff] }
 0x27f   :  { %v606_v29 = vpop.f32.mrf.mxu2 }
 0x280   :  { %v1240_v30 = vpop.eup %1239  ;;  %v618_v32 = vmul.f32 %v1830_v14, %v606_v29 }
 0x281   :  { %v1838_v34 = vmul.f32 %v1240_v30, %v444_v42  ;;  %v536_v35 = vpop.f32.mrf.mxu1  ;;  %v1184_v30 = vld [vmem:[%s1946_s6 + $0x20] sm:$0xff] }
 0x282   :  { %v624_v37 = vsub.f32 %v618_v32, %v622_v25  ;;  %v537_v44 = vadd.f32 %v1228_v24, %v536_v35 }
 0x284   :  { %v626_v46 = vsel %vm414_vm1, %v624_v37, -inf  ;;  %v554_v49 = vmul.f32 %v537_v44, %v1654_v15  ;;  %v552_v53 = vmul.f32 %v537_v44, %v1667_v21  ;;  %v550_v61 = vmul.f32 %v537_v44, %v1690_v28 }
 0x285   :  { %627 = vmax.xlane.f32.xlu1 %v626_v46  ;;  %v548_v5 = vmul.f32 %v537_v44, %v1709_v33  ;;  %v1199_v46 = vld [vmem:[#allocation11] sm:$0xf]  }
 0x286   :  { %v558_v55 = vpack.c.bf16 %v554_v49, %v553_v40  ;;  %v557_v59 = vpack.c.bf16 %v552_v53, %v551_v51  ;;  %v556_v1 = vpack.c.bf16 %v550_v61, %v549_v60  ;;  %v1187_v40 = vld [vmem:[#allocation13 + $0x8] sm:$0xff]  ;;  %v1200_v49 = vunpack.c.0.s8 %v1199_v46 }
 0x287   :  { %v609_v56 = vpop.f32.mrf.mxu2  ;;  %v555_v11 = vpack.c.bf16 %v548_v5, %v547_v4 }
 0x288   :  { %v619_v58 = vmul.f32 %v1835_v26, %v609_v56  ;;  %648 = vmatpush.bf16.msra.mxu3 %v558_v55  ;;  %v1890_v53 = vcvt.s32.f32 %v1200_v49  ;;  %v1201_v55 = vunpack.c.1.s8 %v1199_v46 }
 0x289   :  { %v709_v62 = vpop.f32.mrf.mxu1 }
 0x28a   :  { %v625_v63 = vsub.f32 %v619_v58, %v623_v54  ;;  %v710_v57 = vadd.f32 %v1229_v10, %v709_v62 }
 0x28c   :  { %v629_v0 = vsel %vm414_vm1, %v625_v63, -inf  ;;  %649 = vmatpush.bf16.msra.mxu3 %v557_v59  ;;  %v756_v45 = vmul.f32 %v710_v57, %v1660_v19  ;;  %v754_v52 = vmul.f32 %v710_v57, %v1674_v23  ;;  %v752_v13 = vmul.f32 %v710_v57, %v1700_v31 }
 0x28d   :  { %630 = vmax.xlane.f32.xlu1 %v629_v0  ;;  %v750_v16 = vmul.f32 %v710_v57, %v1716_v36  ;;  %v822_v59 = vcvt.s32.f32 %v1201_v55  ;;  %v1188_v55 = vld [vmem:[#allocation13 + $0x10] sm:$0xff] }
 0x28f   :  { %v826_v5 = vsub.f32 1.0, %v822_v59 }
 0x290   :  { %650 = vmatpush.bf16.msra.mxu3 %v556_v1 }
 0x291   :  { %v711_v48 = vpop.f32.mrf.mxu1 }
 0x292   :  { %v712_v12 = vadd.f32 %v1229_v10, %v711_v48  ;;  %v828_v48 = vmul.f32 1e+30, %v826_v5 }
 0x294   :  { %v757_v43 = vmul.f32 %v712_v12, %v1654_v15  ;;  %651 = vmatpush.bf16.msra.mxu3 %v555_v11  ;;  %v755_v47 = vmul.f32 %v712_v12, %v1667_v21  ;;  %v753_v42 = vmul.f32 %v712_v12, %v1690_v28  ;;  %v751_v9 = vmul.f32 %v712_v12, %v1709_v33 }
 0x296   :  { %1139 = vmatpush.xpose.msk.msrb.mxu0 %vm199_vm0, %v757_v43 }
 0x298   :  { %742 = vmatpush.bf16.msrb.mxu3 %v1185_v27 }
 0x29a   :  { %1140 = vmatpush.xpose.msk.msrb.mxu0 %vm199_vm0, %v756_v45 }
 0x29c   :  { %743 = vmatpush.bf16.msrb.mxu3 %v1184_v30 }
 0x29e   :  { %1141 = vmatpush.xpose.msk.msrb.mxu0 %vm199_vm0, %v755_v47 }
 0x2a2   :  { %1142 = vmatpush.xpose.msk.msrb.mxu0 %vm199_vm0, %v754_v52  ;;  %v1230_v52 = vld [vmem:[#allocation10 + $0x2] ss:$0 sm:$0xff] }
 0x2a6   :  { %1143 = vmatpush.xpose.msk.msrb.mxu0 %vm199_vm0, %v753_v42 }
 0x2aa   :  { %1144 = vmatpush.xpose.msk.msrb.mxu0 %vm199_vm0, %v752_v13 }
 0x2ae   :  { %1145 = vmatpush.xpose.msk.msrb.mxu0 %vm199_vm0, %v751_v9 }
 0x2b2   :  { %1146 = vmatpush.xpose.msk.msrb.mxu0 %vm199_vm0, %v750_v16 }
 0x2f8   :  { %v628_v50 = vpop.xlane.xlu1 %627 }
 0x2f9   :  { %v632_v18 = vsub.f32 %v624_v37, %v628_v50 }
 0x2fb   :  { %v634_v20 = vmul.f32 1.442695, %v632_v18 }
 0x2fd   :  { %1241 = vpow2.f32 %v634_v20 }
 0x300   :  { %v631_v22 = vpop.xlane.xlu1 %630 }
 0x301   :  { %v633_v24 = vsub.f32 %v625_v63, %v631_v22 }
 0x303   :  { %v636_v25 = vmul.f32 1.442695, %v633_v24  ;;  %v1242_v29 = vpop.eup %1241 }
 0x304   :  { %v638_v35 = vmul.f32 %v1242_v29, %v1830_v14  ;;  %v1186_v14 = vld [vmem:[#allocation13] sm:$0xff] }
 0x305   :  { %1243 = vpow2.f32 %v636_v25 }
 0x30b   :  { %v1244_v32 = vpop.eup %1243 }
 0x30c   :  { %v639_v37 = vmul.f32 %v1244_v32, %v1835_v26  ;;  %v923_v26 = vld [vmem:[%s1954_s14] sm:$0x1] }
 0x30d   :  { %1202 = vpush %v923_v26 }
 0x30e   :  { %v640_v38 = vpack.c.bf16 %v639_v37, %v638_v35 }
 0x310   :  { %1110 = vmatmul.msk.bf16.vlgmr.msra.gmra.mxu3 %vm414_vm1, %v640_v38  ;;  %1111 = vmatmul.msk.bf16.vlgmr.msra.gmra.mxu0 %vm414_vm1, %v640_v38 }
 0x311   :  { %915 = vmatpush.bf16.msra.mxu3 %v1187_v40 }
 0x315   :  { %916 = vmatpush.bf16.msra.mxu3 %v1186_v14 }
 0x320   :  { %1147 = vmatmul.msk.f32.vlgmr.msrb.gmra.mxu0 %vm199_vm0, %v1720_v39  ;;  %1138 = vmatmul.msk.bf16.vlgmr.msrb.gmra.mxu3 %vm199_vm0, %v1636_v8 }
 0x328   :  { %1148 = vmatmul.msk.f32.gmra.mxu0 %vm199_vm0, %v1727_v41  ;;  %v825_v41 = vsub.f32 1.0, %v1890_v53 }
 0x32a   :  { %v827_v58 = vmul.f32 1e+30, %v825_v41  ;;  %v1189_v41 = vld [vmem:[#allocation13 + $0x18] sm:$0xff] }
 0x33e   :  { %s1203_s20 = spop %1202 }
 0x33f   :  { %v926_v40 = vstv %s1203_s20 }
 0x38d   :  { %v667_v44 = vpop.f32.mrf.mxu0 }
 0x38e   :  { %v672_v51 = vmax.f32 %v667_v44, 1e-30 }
 0x390   :  { %1245 = vrcp.f32 %v672_v51 }
 0x393   :  { %v653_v39 = vpop.f32.mrf.mxu3 }
 0x395   :  { %v669_v8 = vpop.f32.mrf.mxu0 }
 0x396   :  { %v673_v54 = vmax.f32 %v669_v8, 1e-30  ;;  %v1246_v56 = vpop.eup %1245 }
 0x397   :  { %v676_v0 = vmul.f32 %v1246_v56, %v653_v39  ;;  %v929_v39 = vmul.f32 %v926_v40, %v1628_v3 }
 0x398   :  { %1247 = vrcp.f32 %v673_v54 }
 0x39b   :  { %v655_v62 = vpop.f32.mrf.mxu3 }
 0x39d   :  { %v811_v60 = vpop.f32.mrf.mxu0 }
 0x39e   :  { %v1248_v61 = vpop.eup %1247  ;;  %v823_v63 = vmul.f32 %v1890_v53, %v811_v60 }
 0x39f   :  { %v677_v1 = vmul.f32 %v1248_v61, %v655_v62 }
 0x3a0   :  { %v829_v4 = vsub.f32 %v823_v63, %v827_v58 }
 0x3a1   :  { %v885_v10 = vpack.c.bf16 %v677_v1, %v676_v0 }
 0x3a2   :  { %v831_v11 = vsel %vm414_vm1, %v829_v4, -inf }
 0x3a3   :  { %832 = vmax.xlane.f32.xlu2 %v831_v11  ;;  %1159 = vmatmul.msk.bf16.vlgmr.msra.gmra.mxu3 %vm199_vm0, %v885_v10  ;;  %v745_v47 = vpop.f32.mrf.mxu3 }
 0x3a4   :  { %v746_v13 = vadd.f32 %v1230_v52, %v745_v47 }
 0x3a5   :  { %v814_v57 = vpop.f32.mrf.mxu0 }
 0x3a6   :  { %v824_v12 = vmul.f32 %v822_v59, %v814_v57  ;;  %v764_v16 = vmul.f32 %v746_v13, %v1660_v19  ;;  %v762_v20 = vmul.f32 %v746_v13, %v1674_v23  ;;  %v760_v25 = vmul.f32 %v746_v13, %v1700_v31 }
 0x3a7   :  { %v758_v30 = vmul.f32 %v746_v13, %v1716_v36  ;;  %v928_v31 = vmul.f32 %v926_v40, %v1626_v2 }
 0x3a8   :  { %v830_v43 = vsub.f32 %v824_v12, %v828_v48 }
 0x3aa   :  { %v834_v45 = vsel %vm414_vm1, %v830_v43, -inf }
 0x3ab   :  { %835 = vmax.xlane.f32.xlu2 %v834_v45  ;;  %v747_v42 = vpop.f32.mrf.mxu3 }
 0x3ac   :  { %v748_v9 = vadd.f32 %v1230_v52, %v747_v42 }
 0x3ae   :  { %v765_v50 = vmul.f32 %v748_v9, %v1654_v15  ;;  %v763_v22 = vmul.f32 %v748_v9, %v1667_v21  ;;  %v761_v27 = vmul.f32 %v748_v9, %v1690_v28  ;;  %v759_v19 = vmul.f32 %v748_v9, %v1709_v33  ;;  %v1231_v28 = vld [vmem:[%s1953_s13] ss:$0 sm:$0xff] }
 0x3b0   :  { %v769_v18 = vpack.c.bf16 %v765_v50, %v764_v16  ;;  %v768_v24 = vpack.c.bf16 %v763_v22, %v762_v20  ;;  %v767_v29 = vpack.c.bf16 %v761_v27, %v760_v25  ;;  %v766_v32 = vpack.c.bf16 %v759_v19, %v758_v30 }
 0x3b2   :  { %853 = vmatpush.bf16.msra.mxu1 %v769_v18 }
 0x3b6   :  { %854 = vmatpush.bf16.msra.mxu1 %v768_v24 }
 0x3ba   :  { %855 = vmatpush.bf16.msra.mxu1 %v767_v29 }
 0x3be   :  { %856 = vmatpush.bf16.msra.mxu1 %v766_v32 }
 0x3c2   :  { %966 = vmatpush.bf16.msrb.mxu1 %v1189_v41 }
 0x3c6   :  { %967 = vmatpush.bf16.msrb.mxu1 %v1188_v55 }
 0x416   :  { %v833_v15 = vpop.xlane.xlu2 %832 }
 0x417   :  { %v837_v35 = vsub.f32 %v829_v4, %v833_v15 }
 0x419   :  { %v839_v37 = vmul.f32 1.442695, %v837_v35 }
 0x41b   :  { %1249 = vpow2.f32 %v839_v37 }
 0x41e   :  { %v836_v23 = vpop.xlane.xlu2 %835 }
 0x41f   :  { %v838_v38 = vsub.f32 %v830_v43, %v836_v23 }
 0x421   :  { %v841_v21 = vmul.f32 1.442695, %v838_v38  ;;  %v1250_v33 = vpop.eup %1249 }
 0x422   :  { %v843_v46 = vmul.f32 %v1250_v33, %v1890_v53  ;;  %v974_v53 = vld [vmem:[%s1954_s14 + $0x1] sm:$0x1]  ;;  %s1500_s14 = smov [#allocation14]  }
 0x423   :  { %1251 = vpow2.f32 %v841_v21  ;;  %1204 = vpush %v974_v53  ;;  %s989_s3 = sshll.u32 %s1500_s14, 4  ;;  %s990_s3 = int_to_ptr.vmem [resolvable:$true] %s989_s3 }
 0x426   :  { %v918_v36 = vpop.f32.mrf.mxu3 }
 0x427   :  { %v919_v14 = vadd.f32 %v1231_v28, %v918_v36 }
 0x429   :  { %v1252_v26 = vpop.eup %1251  ;;  %v930_v44 = vadd.f32 %v928_v31, %v919_v14 }
 0x42a   :  { %v844_v49 = vmul.f32 %v1252_v26, %v822_v59 }
 0x42b   :  { %932 = vst.msk [vmem:[#allocation14] sm:$0xff] %vm199_vm0, %v930_v44 }
 0x42c   :  { %v845_v51 = vpack.c.bf16 %v844_v49, %v843_v46 }
 0x42e   :  { %1149 = vmatmul.msk.bf16.vlgmr.msra.gmra.mxu1 %vm414_vm1, %v845_v51  ;;  %1150 = vmatmul.msk.bf16.vlgmr.msrb.gmra.mxu2 %vm414_vm1, %v845_v51  ;;  %v920_v8 = vpop.f32.mrf.mxu3 }
 0x42f   :  { %v921_v54 = vadd.f32 %v1231_v28, %v920_v8 }
 0x431   :  { %v931_v2 = vadd.f32 %v929_v39, %v921_v54 }
 0x433   :  { %933 = vst.msk [vmem:[#allocation14 + $0x8] sm:$0xff] %vm199_vm0, %v931_v2 }
 0x434   :  { %997 = dma.vmem_to_hbm [thread:$0]  %s990_s3, 256, %s992_s25, [#allocation4], %s1965_s19, %s1965_s19, %s1964_s11  }
 0x454   :  { %s1205_s29 = spop %1204 }
 0x455   :  { %v977_v11 = vstv %s1205_s29 }
 0x456   :  { %v980_v43 = vmul.f32 %v977_v11, %v1632_v7 }
 0x4ab   :  { %v858_v58 = vpop.f32.mrf.mxu1 }
 0x4b1   :  { %v872_v56 = vpop.f32.mrf.mxu2 }
 0x4b2   :  { %v877_v3 = vmax.f32 %v872_v56, 1e-30 }
 0x4b3   :  { %v860_v0 = vpop.f32.mrf.mxu1 }
 0x4b4   :  { %1253 = vrcp.f32 %v877_v3 }
 0x4b9   :  { %v874_v59 = vpop.f32.mrf.mxu2 }
 0x4ba   :  { %v878_v60 = vmax.f32 %v874_v59, 1e-30  ;;  %v1254_v61 = vpop.eup %1253 }
 0x4bb   :  { %v881_v62 = vmul.f32 %v1254_v61, %v858_v58 }
 0x4bc   :  { %1255 = vrcp.f32 %v878_v60 }
 0x4bd   :  { %v883_v4 = vadd.f32 %v881_v62, %v1832_v17  ;;  %v1232_v17 = vld [vmem:[%s1953_s13 + $0x1] ss:$0 sm:$0xff] }
 0x4c2   :  { %v1256_v63 = vpop.eup %1255 }
 0x4c3   :  { %v882_v1 = vmul.f32 %v1256_v63, %v860_v0 }
 0x4c5   :  { %v884_v5 = vadd.f32 %v882_v1, %v1838_v34  ;;  %v979_v34 = vmul.f32 %v977_v11, %v1630_v6 }
 0x4c7   :  { %v934_v10 = vpack.c.bf16 %v884_v5, %v883_v4 }
 0x4c9   :  { %1169 = vmatmul.msk.bf16.vlgmr.msrb.gmra.mxu1 %vm199_vm0, %v934_v10 }
 0x546   :  { %v969_v48 = vpop.f32.mrf.mxu1 }
 0x547   :  { %v970_v57 = vadd.f32 %v1232_v17, %v969_v48 }
 0x549   :  { %v981_v12 = vadd.f32 %v979_v34, %v970_v57 }
 0x54b   :  { %983 = vst.msk [vmem:[#allocation15] sm:$0xff] %vm199_vm0, %v981_v12 }
 0x54e   :  { %v971_v45 = vpop.f32.mrf.mxu1 }
 0x54f   :  { %v972_v47 = vadd.f32 %v1232_v17, %v971_v45 }
 0x551   :  { %v982_v52 = vadd.f32 %v980_v43, %v972_v47 }
 0x553   :  { %984 = vst.msk [vmem:[#allocation15 + $0x8] sm:$0xff] %vm199_vm0, %v982_v52 }
 0x554   :  { %1010 = dma.vmem_to_hbm [thread:$0]  %s1003_s27, 256, %s1005_s4, [#allocation16], %s1965_s19, %s1965_s19, %s1964_s11  }
 0x555   :  { %1481 = dma.done.wait [#allocation4], 256  }
 0x556   :  { %1482 = vsyncadd [#allocation4], 4294967040 }
 0x557   :  { %1483 = dma.done.wait [#allocation16], 256  }
 0x558   :  { %1484 = vsyncadd [#allocation16], 4294967040 }
 0x559   :  { %1019 = vsyncpa [#allocation3], 1 }
 0x55a   :  { %1020 = vsyncpa [#allocation6], 1 }
 0x55b   :  { %1021 = vsyncpa [#allocation9], 1 }
 0x55c   :  { %1022 = vsyncpa [#allocation12], 1 }
 0x55d   :  { %1023 = vsyncpa [#allocation4], 1 }
 0x55e   :  { %1024 = vsyncpa [#allocation16], 1 }

</bundles_post_ra>
